<compile_context>
chip_gen: v5e
topology: v5e:2x2
jax: 0.10.0
libtpu: 0.0.40
codegen_flags: <defaults>
</compile_context>

<pallas_src>
import jax
import jax.numpy as jnp
from jax.experimental import pallas as pl
from jax.experimental.pallas import tpu as pltpu

LANES = 128
SUBLANES = 8
MAX_TILE_ROWS = 8192  # 8192 rows x 128 lanes x 4 B = 4 MiB per f32 input block


def _make_l1_kernel(tile_rows, rows_valid, blocks_per_shard, needs_mask):
    groups = tile_rows // SUBLANES

    def accum(acc_ref, d):
        # Deferred reduction: per-step work is only vreg-wise VPU adds into a
        # (8, 128) accumulator; no cross-lane (XLU) reduce in the steady state.
        acc_ref[...] += d.reshape(groups, SUBLANES, LANES).sum(axis=0)

    def kernel(g_ref, t_ref, acc_ref):
        c = pl.program_id(0)  # shard axis ("parallel")
        j = pl.program_id(1)  # reduction axis ("arbitrary")

        @pl.when(j == 0)
        def _init():
            acc_ref[...] = jnp.zeros_like(acc_ref)

        d = jnp.abs(g_ref[...].astype(jnp.float32) - t_ref[...].astype(jnp.float32))

        if needs_mask:
            block_idx = c * blocks_per_shard + j
            block_end = (block_idx + 1) * tile_rows
            is_edge = block_end > rows_valid  # partial last tile or clamped
            # overshoot block (must be fully/partially zeroed).

            @pl.when(jnp.logical_not(is_edge))
            def _full():
                accum(acc_ref, d)

            @pl.when(is_edge)
            def _partial():
                row = block_idx * tile_rows + jax.lax.broadcasted_iota(
                    jnp.int32, d.shape, 0
                )
                accum(acc_ref, jnp.where(row < rows_valid, d, jnp.float32(0.0)))
        else:
            accum(acc_ref, d)

    return kernel


def l1_loss(generated: jax.Array, target: jax.Array) -> jax.Array:
    """Equivalent of torch.nn.functional.l1_loss(generated, target) (mean reduction)."""
    assert generated.shape == target.shape, "shapes must match"
    n_elems = generated.size
    result_dtype = jnp.promote_types(generated.dtype, target.dtype)

    g = generated.reshape(-1)
    t = target.reshape(-1)

    # Layout: (rows, 128). For large inputs pad only to a multiple of 128 (the
    # partial row-tile is masked in-kernel); for small inputs pad to a multiple
    # of 1024 so one full-extent tile covers everything (pad cost is trivial).
    if n_elems >= MAX_TILE_ROWS * LANES:
        pad_unit = LANES
        tile_rows = MAX_TILE_ROWS
    else:
        pad_unit = SUBLANES * LANES
        tile_rows = None
    padded = ((n_elems + pad_unit - 1) // pad_unit) * pad_unit
    if padded != n_elems:
        g = jnp.pad(g, (0, padded - n_elems))
        t = jnp.pad(t, (0, padded - n_elems))
    rows = padded // LANES
    if tile_rows is None:
        tile_rows = rows  # single tile; rows is a multiple of 8 here

    g2 = g.reshape(rows, LANES)
    t2 = t.reshape(rows, LANES)

    num_blocks = (rows + tile_rows - 1) // tile_rows
    num_shards = 2 if num_blocks >= 2 else 1  # lets v7x megacore split the work
    blocks_per_shard = (num_blocks + num_shards - 1) // num_shards
    # Mask needed whenever the (shards x blocks x tile_rows) coverage overshoots
    # the valid row extent (partial last tile and/or duplicated clamped block).
    needs_mask = (num_shards * blocks_per_shard * tile_rows) != rows

    kernel = _make_l1_kernel(tile_rows, rows, blocks_per_shard, needs_mask)

    def in_map(c, j):
        # Clamp so the DMA'd block index is always valid; overshoot blocks are
        # fully zeroed by the in-kernel mask.
        return (jnp.minimum(c * blocks_per_shard + j, num_blocks - 1), 0)

    bytes_accessed = padded * (g2.dtype.itemsize + t2.dtype.itemsize)
    cost = pl.CostEstimate(
        flops=3 * padded,  # sub + abs + add per element
        transcendentals=0,
        bytes_accessed=bytes_accessed + num_shards * SUBLANES * LANES * 4,
    )

    partials = pl.pallas_call(
        kernel,
        out_shape=jax.ShapeDtypeStruct((num_shards, SUBLANES, LANES), jnp.float32),
        grid_spec=pltpu.PrefetchScalarGridSpec(
            num_scalar_prefetch=0,
            grid=(num_shards, blocks_per_shard),
            in_specs=[
                pl.BlockSpec((tile_rows, LANES), in_map),
                pl.BlockSpec((tile_rows, LANES), in_map),
            ],
            out_specs=pl.BlockSpec((None, SUBLANES, LANES), lambda c, j: (c, 0, 0)),
        ),
        compiler_params=pltpu.CompilerParams(
            dimension_semantics=("parallel", "arbitrary"),
            vmem_limit_bytes=32 * 1024 * 1024,
        ),
        cost_estimate=cost,
    )(g2, t2)

    total = jnp.sum(partials, dtype=jnp.float32)
    mean = total / jnp.float32(n_elems)
    # torch.nn.functional.l1_loss returns the promoted input dtype.
    return mean.astype(result_dtype)


def _check(generated, target, rtol=1e-5, atol=1e-5):
    out = jax.block_until_ready(l1_loss(generated, target))
    ref = jnp.mean(jnp.abs(generated.astype(jnp.float32) - target.astype(jnp.float32)))
    assert jnp.allclose(out, ref.astype(out.dtype), rtol=rtol, atol=atol), (out, ref)
    return out


if __name__ == "__main__":
    key = jax.random.PRNGKey(0)
    k1, k2 = jax.random.split(key)

    # NCHW-like shapes consistent with an image-to-image GAN loss.
    generated = jax.random.normal(k1, (2, 4, 16, 16), dtype=jnp.float32)
    target = jax.random.normal(k2, (2, 4, 16, 16), dtype=jnp.float32)
    _check(generated, target)

    # Non-multiple-of-1024 size (small masked/padded path).
    g2 = jax.random.normal(k1, (3, 5, 7, 11), dtype=jnp.float32)
    t2 = jax.random.normal(k2, (3, 5, 7, 11), dtype=jnp.float32)
    _check(g2, t2)

    # Large, exact multi-block coverage (2 blocks, no mask, megacore split).
    g3 = jax.random.normal(k1, (4, 8, 256, 256), dtype=jnp.float32)
    t3 = jax.random.normal(k2, (4, 8, 256, 256), dtype=jnp.float32)
    _check(g3, t3)

    # Large with ragged tail (multi-block masked partial-tile path).
    g4 = jax.random.normal(k1, (2, 7, 300, 301), dtype=jnp.float32)
    t4 = jax.random.normal(k2, (2, 7, 300, 301), dtype=jnp.float32)
    _check(g4, t4)

    print("KERNEL_OK")
</pallas_src>

<mosaic_0001>
module attributes {stable_mosaic.version = 11 : i64} {
  func.func @kernel(%arg0: i32, %arg1: i32, %arg2: memref<16x128xf32, #tpu.memory_space<vmem>>, %arg3: memref<16x128xf32, #tpu.memory_space<vmem>>, %arg4: memref<1x8x128xf32, #tpu.memory_space<vmem>>) attributes {dimension_semantics = [#tpu.dimension_semantics<parallel>, #tpu.dimension_semantics<arbitrary>], iteration_bounds = array<i64: 1, 1>, scalar_prefetch = 0 : i64, scratch_operands = 0 : i64, tpu.core_type = #tpu.core_type<tc>, window_params = [{transform_indices = @transform_0, window_bounds = array<i64: 16, 128>}, {transform_indices = @transform_1, window_bounds = array<i64: 16, 128>}, {transform_indices = @transform_2, window_bounds = array<i64: 1, 8, 128>}]} {
    %c0_i32 = arith.constant 0 : i32
    %0 = arith.cmpi eq, %arg1, %c0_i32 : i32
    %1 = arith.extui %0 : i1 to i32
    %c0_i32_0 = arith.constant 0 : i32
    %2 = arith.cmpi ne, %1, %c0_i32_0 : i32
    scf.if %2 {
      %cst_10 = arith.constant 0.000000e+00 : f32
      %15 = vector.broadcast %cst_10 : f32 to vector<8x128xf32>
      %c0_11 = arith.constant 0 : index
      %c0_12 = arith.constant 0 : index
      %c0_13 = arith.constant 0 : index
      %16 = vector.load %arg4[%c0_11, %c0_12, %c0_13] : memref<1x8x128xf32, #tpu.memory_space<vmem>>, vector<1x8x128xf32>
      %17 = vector.shape_cast %16 : vector<1x8x128xf32> to vector<8x128xf32>
      %18 = vector.shape_cast %15 : vector<8x128xf32> to vector<1x8x128xf32>
      tpu.vector_store %arg4[%c0_11, %c0_12, %c0_13], %18 {strides = array<i32>} : memref<1x8x128xf32, #tpu.memory_space<vmem>>, vector<1x8x128xf32>,
    } else {
    }
    %c0 = arith.constant 0 : index
    %c0_1 = arith.constant 0 : index
    %3 = vector.load %arg2[%c0, %c0_1] : memref<16x128xf32, #tpu.memory_space<vmem>>, vector<16x128xf32>
    %c0_2 = arith.constant 0 : index
    %c0_3 = arith.constant 0 : index
    %4 = vector.load %arg3[%c0_2, %c0_3] : memref<16x128xf32, #tpu.memory_space<vmem>>, vector<16x128xf32>
    %5 = arith.subf %3, %4 : vector<16x128xf32>
    %6 = math.absf %5 : vector<16x128xf32>
    %c0_4 = arith.constant 0 : index
    %c0_5 = arith.constant 0 : index
    %c0_6 = arith.constant 0 : index
    %7 = vector.load %arg4[%c0_4, %c0_5, %c0_6] : memref<1x8x128xf32, #tpu.memory_space<vmem>>, vector<1x8x128xf32>
    %8 = vector.shape_cast %7 : vector<1x8x128xf32> to vector<8x128xf32>
    %9 = vector.shape_cast %6 : vector<16x128xf32> to vector<2x8x128xf32>
    %cst = arith.constant dense<0.000000e+00> : vector<8x128xf32>
    %10 = vector.multi_reduction <add>, %9, %cst [0] : vector<2x8x128xf32> to vector<8x128xf32>
    %11 = arith.addf %8, %10 : vector<8x128xf32>
    %c0_7 = arith.constant 0 : index
    %c0_8 = arith.constant 0 : index
    %c0_9 = arith.constant 0 : index
    %12 = vector.load %arg4[%c0_7, %c0_8, %c0_9] : memref<1x8x128xf32, #tpu.memory_space<vmem>>, vector<1x8x128xf32>
    %13 = vector.shape_cast %12 : vector<1x8x128xf32> to vector<8x128xf32>
    %14 = vector.shape_cast %11 : vector<8x128xf32> to vector<1x8x128xf32>
    tpu.vector_store %arg4[%c0_7, %c0_8, %c0_9], %14 {strides = array<i32>} : memref<1x8x128xf32, #tpu.memory_space<vmem>>, vector<1x8x128xf32>,
    return
  }
  func.func @transform_0(%arg0: i32, %arg1: i32) -> (i32, i32) {
    %c1_i32 = arith.constant 1 : i32
    %0 = arith.muli %arg0, %c1_i32 : i32
    %1 = arith.addi %0, %arg1 : i32
    %c0_i32 = arith.constant 0 : i32
    %2 = arith.minsi %1, %c0_i32 : i32
    %c0_i32_0 = arith.constant 0 : i32
    %c0_i32_1 = arith.constant 0 : i32
    return %2, %c0_i32_0 : i32, i32
  }
  func.func @transform_1(%arg0: i32, %arg1: i32) -> (i32, i32) {
    %c1_i32 = arith.constant 1 : i32
    %0 = arith.muli %arg0, %c1_i32 : i32
    %1 = arith.addi %0, %arg1 : i32
    %c0_i32 = arith.constant 0 : i32
    %2 = arith.minsi %1, %c0_i32 : i32
    %c0_i32_0 = arith.constant 0 : i32
    %c0_i32_1 = arith.constant 0 : i32
    return %2, %c0_i32_0 : i32, i32
  }
  func.func @transform_2(%arg0: i32, %arg1: i32) -> (i32, i32, i32) {
    %c0_i32 = arith.constant 0 : i32
    %c0_i32_0 = arith.constant 0 : i32
    %c0_i32_1 = arith.constant 0 : i32
    return %arg0, %c0_i32, %c0_i32_0 : i32, i32, i32
  }
}

</mosaic_0001>

<bundles_post_ra>
// kernel: tpu_custom_call.1
= control target key start
LH: loop header
LB: loop body
LE: loop exit
PB: predicated region body
PF: predicated region fallthrough
CT: control target
= control target key end

     0   :  { %7 = vsyncpa [#allocation3], 0  ;;  %s216_s0 = inlined_call_operand.hbm [shape: f32[16,128], index: 0, kind: input, shape index: {}]   ;;  %s217_s1 = inlined_call_operand.hbm [shape: f32[16,128], index: 1, kind: input, shape index: {}]   ;;  %s218_s2 = inlined_call_operand.hbm [shape: f32[1,8,128], index: 2, kind: output, shape index: {}]  }
   0x1   :  { %8 = vsyncpa [#allocation6], 0 }
   0x2   :  { %9 = vsyncpa [#allocation4], 0  ;;  %s20_s11 = sshll.u32 %s216_s0, 4  ;;  %s187_s12 = smov [#allocation2]   ;;  %s21_s11 = int_to_ptr.hbm [resolvable:$true] %s20_s11 }
   0x3   :  { %s22_s13 = sshll.u32 %s187_s12, 4  ;;  %s39_s16 = sshll.u32 %s217_s1, 4  ;;  %s23_s13 = int_to_ptr.vmem [resolvable:$true] %s22_s13  ;;  %s40_s16 = int_to_ptr.hbm [resolvable:$true] %s39_s16 }
   0x4   :  { %s188_s17 = smov 128   ;;  %s189_s18 = smov 8  }
   0x5   :  { %28 = dma.hbm_to_vmem [thread:$0]  %s21_s11, 256, %s23_s13, [#allocation3], %s188_s17, %s188_s17, %s189_s18  }
   0x6   :  { %s190_s19 = smov [#allocation5]  }
   0x7   :  { %s41_s20 = sshll.u32 %s190_s19, 4  ;;  %s42_s20 = int_to_ptr.vmem [resolvable:$true] %s41_s20 }
   0x8   :  { %47 = dma.hbm_to_vmem [thread:$0]  %s40_s16, 256, %s42_s20, [#allocation6], %s188_s17, %s188_s17, %s189_s18  }
   0x9   :  { %181 = dma.done.wait [#allocation3], 256  }
   0xa   :  { %182 = vsyncadd [#allocation3], 4294967040 }
   0xb   :  { %183 = dma.done.wait [#allocation6], 256  }
   0xc   :  { %184 = vsyncadd [#allocation6], 4294967040  ;;  %v69_v0 = vld [vmem:[#allocation2] sm:$0xff]  ;;  %v70_v1 = vld [vmem:[#allocation2 + $0x8] sm:$0xff]  ;;  %s191_s0 = smov [#allocation7]   ;;  %s88_s23 = sshll.u32 %s218_s2, 4  ;;  %s89_s23 = int_to_ptr.hbm [resolvable:$true] %s88_s23 }
   0xd   :  { %v71_v2 = vld [vmem:[#allocation5] sm:$0xff]  ;;  %v72_v3 = vld [vmem:[#allocation5 + $0x8] sm:$0xff]  ;;  %s86_s1 = sshll.u32 %s191_s0, 4  ;;  %s87_s1 = int_to_ptr.vmem [resolvable:$true] %s86_s1 }
   0xe   :  { %v73_v4 = vsub.f32 %v69_v0, %v71_v2  ;;  %v74_v5 = vsub.f32 %v70_v1, %v72_v3 }
  0x10   :  { %v75_v6 = vand.u32 2147483647, %v73_v4  ;;  %v76_v7 = vand.u32 2147483647, %v74_v5 }
  0x12   :  { %v78_v8 = vadd.f32 %v76_v7, %v75_v6 }
  0x14   :  { %80 = vst [vmem:[#allocation7] sm:$0xff] %v78_v8 }
  0x15   :  { %91 = dma.vmem_to_hbm [thread:$0]  %s87_s1, 128, %s89_s23, [#allocation4]  }
  0x16   :  { %185 = dma.done.wait [#allocation4], 128  }
  0x17   :  { %186 = vsyncadd [#allocation4], 4294967168 }
  0x18   :  { %96 = vsyncpa [#allocation3], 1 }
  0x19   :  { %97 = vsyncpa [#allocation6], 1 }
  0x1a   :  { %98 = vsyncpa [#allocation4], 1 }

</bundles_post_ra>
